<compile_context>
chip_gen: v6e
topology: v6e:2x2x1
jax: 0.10.0
libtpu: 0.0.40
codegen_flags: <defaults>
</compile_context>

<pallas_src>
import jax
import jax.numpy as jnp
from jax.experimental import pallas as pl
from jax.experimental.pallas import tpu as pltpu


NUM_HIDDEN_LAYERS = 12
LAYER_START = 4


# ------------------------------------------------------------------ kernels
def _wlp_kernel_f32(w_ref, x_ref, o_ref):
    # w_ref: SMEM (L_used,) f32 pre-normalized weights (scalar prefetch)
    # x_ref: VMEM (1, TR, C) one layer's tile
    # o_ref: VMEM (TR, C) f32 output tile, resident across the layer axis
    l = pl.program_id(1)

    @pl.when(l == 0)
    def _():
        o_ref[...] = jnp.zeros_like(o_ref)

    o_ref[...] += w_ref[l] * x_ref[0]


def _wlp_kernel_acc(w_ref, x_ref, o_ref, acc_ref):
    # Narrow-output path: accumulate in a resident f32 scratch, cast once.
    l = pl.program_id(1)

    @pl.when(l == 0)
    def _():
        acc_ref[...] = jnp.zeros_like(acc_ref)

    acc_ref[...] += w_ref[l] * x_ref[0].astype(jnp.float32)

    @pl.when(l == pl.num_programs(1) - 1)
    def _():
        o_ref[...] = acc_ref[...].astype(o_ref.dtype)


# ------------------------------------------------------------------ helpers
def _flat_layout(B, S, H):
    """Factor the elementwise (B,S,H) domain into (rows, cols) with the
    widest lane-dense (multiple-of-128, <=2048) column width possible."""
    N = B * S * H
    if N % 128 == 0:
        for mult in range(2048 // 128, 0, -1):
            c = mult * 128
            if N % c == 0:
                return N // c, c
    # Fallback: natural layout (correct, possibly lane-padded).
    return B * S, H


def _row_tile(R, C, itemsize, target_bytes):
    """Row tile sized to ~target_bytes per layer-block, aligned to the dtype's
    native sublane pack, with an even tile count preferred (v7x balance)."""
    sub = {4: 8, 2: 16, 1: 32}.get(itemsize, 8)
    if R <= sub:
        return R
    tr = max(target_bytes // (C * itemsize), sub)
    if tr >= R:
        return R
    tr -= tr % sub
    nt = -(-R // tr)
    if nt > 1 and nt % 2:               # prefer even #tiles for 2 TCs
        nt += 1
        tr = -(-R // nt)
        tr += (-tr) % sub
        tr = min(tr, R)
    return max(tr, sub)


def _vmem_budget():
    """(target block bytes per layer, vmem_limit_bytes) per TPU generation."""
    try:
        info = pltpu.get_tpu_info()
        vmem = getattr(info, "vmem_capacity_bytes", 64 * 1024 * 1024)
    except Exception:
        vmem = 64 * 1024 * 1024
    if vmem >= 100 * 1024 * 1024:
        # v5e / v6e: 128 MiB physical VMEM -> 8 MiB blocks, 64 MiB scoped.
        return 8 * 1024 * 1024, 64 * 1024 * 1024
    # v7x: 64 MiB per TC -> 4 MiB blocks, keep limit <= 48 MiB.
    return 4 * 1024 * 1024, 48 * 1024 * 1024


# ------------------------------------------------------------------ wrapper
def weighted_layer_pooling(all_hidden_states, layer_weights, layer_start=LAYER_START):
    """all_hidden_states: (num_layers+1, B, S, H); layer_weights: (L_used,)."""
    L_total, B, S, H = all_hidden_states.shape
    L_used = L_total - layer_start
    assert layer_weights.shape == (L_used,)

    dtype = all_hidden_states.dtype
    itemsize = jnp.dtype(dtype).itemsize

    # Free contiguous reshape of the whole stack (no slice copy).
    R, C = _flat_layout(B, S, H)
    x = all_hidden_states.reshape(L_total, R, C)

    # Pre-normalize weights -> kernel body is a pure FMA chain.
    # TODO(synk): divide-before-accumulate reorders rounding vs sum-then-divide
    # at f32 ULP level (within test tolerance).
    w_norm = (layer_weights / jnp.sum(layer_weights)).astype(jnp.float32)

    target_block_bytes, vmem_limit = _vmem_budget()
    TR = _row_tile(R, C, itemsize, target_block_bytes)
    grid = (-(-R // TR), L_used)

    f32_out = dtype == jnp.float32
    kernel = _wlp_kernel_f32 if f32_out else _wlp_kernel_acc
    scratch = [] if f32_out else [pltpu.VMEM((TR, C), jnp.float32)]

    out = pl.pallas_call(
        kernel,
        out_shape=jax.ShapeDtypeStruct((R, C), dtype),
        grid_spec=pltpu.PrefetchScalarGridSpec(
            # Layer weights land in SMEM once, before the grid runs.
            num_scalar_prefetch=1,
            grid=grid,
            in_specs=[
                # One layer's row tile; layer offset folded into the index_map.
                pl.BlockSpec((1, TR, C), lambda i, l, w: (layer_start + l, i, 0)),
            ],
            out_specs=pl.BlockSpec((TR, C), lambda i, l, w: (i, 0)),
            scratch_shapes=scratch,
        ),
        compiler_params=pltpu.CompilerParams(
            # Row axis parallel (megacore sharding on v7x), layer axis is the
            # reduction -> arbitrary.
            dimension_semantics=("parallel", "arbitrary"),
            vmem_limit_bytes=vmem_limit,
        ),
    )(w_norm, x)

    return out.reshape(B, S, H)


def _reference(all_hidden_states, layer_weights, layer_start=LAYER_START):
    x = all_hidden_states[layer_start:]
    w = layer_weights[:, None, None, None]
    return (w * x).sum(axis=0) / layer_weights.sum()


if __name__ == "__main__":
    key = jax.random.PRNGKey(0)
    B, S, H = 2, 8, 32
    L_total = NUM_HIDDEN_LAYERS + 1          # 13 stacked hidden states
    L_used = L_total - LAYER_START           # 9 pooled layers

    all_hidden_states = jax.random.normal(key, (L_total, B, S, H), dtype=jnp.float32)
    # Deterministic parameter init, matching nn.Parameter(torch.tensor([1]*L_used)).
    layer_weights = jnp.ones((L_used,), dtype=jnp.float32)

    out = weighted_layer_pooling(all_hidden_states, layer_weights)
    out = jax.block_until_ready(out)

    ref = _reference(all_hidden_states, layer_weights)
    assert out.shape == (B, S, H)
    assert jnp.allclose(out, ref, atol=1e-5, rtol=1e-5), "mismatch vs reference"

    print("KERNEL_OK")
</pallas_src>

<mosaic_0001>
module attributes {stable_mosaic.version = 11 : i64} {
  func.func @_wlp_kernel_f32(%arg0: i32, %arg1: i32, %arg2: memref<9xf32, #tpu.memory_space<smem>>, %arg3: memref<1x1x512xf32, #tpu.memory_space<vmem>>, %arg4: memref<1x512xf32, #tpu.memory_space<vmem>>) attributes {dimension_semantics = [#tpu.dimension_semantics<parallel>, #tpu.dimension_semantics<arbitrary>], iteration_bounds = array<i64: 1, 9>, scalar_prefetch = 1 : i64, scratch_operands = 0 : i64, tpu.core_type = #tpu.core_type<tc>, window_params = [{transform_indices = @transform_0, window_bounds = array<i64: 1, 1, 512>}, {transform_indices = @transform_1, window_bounds = array<i64: 1, 512>}]} {
    %c0_i32 = arith.constant 0 : i32
    %0 = arith.cmpi eq, %arg1, %c0_i32 : i32
    %1 = arith.extui %0 : i1 to i32
    %c0_i32_0 = arith.constant 0 : i32
    %2 = arith.cmpi ne, %1, %c0_i32_0 : i32
    scf.if %2 {
      %cst = arith.constant 0.000000e+00 : f32
      %12 = vector.broadcast %cst : f32 to vector<1x512xf32>
      %c0_7 = arith.constant 0 : index
      %c0_8 = arith.constant 0 : index
      %13 = vector.load %arg4[%c0_7, %c0_8] : memref<1x512xf32, #tpu.memory_space<vmem>>, vector<1x512xf32>
      tpu.vector_store %arg4[%c0_7, %c0_8], %12 {strides = array<i32>} : memref<1x512xf32, #tpu.memory_space<vmem>>, vector<1x512xf32>,
    } else {
    }
    %c0 = arith.constant 0 : index
    %c0_1 = arith.constant 0 : index
    %3 = vector.load %arg4[%c0, %c0_1] : memref<1x512xf32, #tpu.memory_space<vmem>>, vector<1x512xf32>
    %4 = arith.index_cast %arg1 : i32 to index
    %5 = memref.load %arg2[%4] : memref<9xf32, #tpu.memory_space<smem>>
    %c0_2 = arith.constant 0 : index
    %c0_3 = arith.constant 0 : index
    %c0_4 = arith.constant 0 : index
    %6 = vector.load %arg3[%c0_2, %c0_3, %c0_4] : memref<1x1x512xf32, #tpu.memory_space<vmem>>, vector<1x1x512xf32>
    %7 = vector.shape_cast %6 : vector<1x1x512xf32> to vector<1x512xf32>
    %8 = vector.broadcast %5 : f32 to vector<1x512xf32>
    %9 = arith.mulf %8, %7 : vector<1x512xf32>
    %10 = arith.addf %3, %9 : vector<1x512xf32>
    %c0_5 = arith.constant 0 : index
    %c0_6 = arith.constant 0 : index
    %11 = vector.load %arg4[%c0_5, %c0_6] : memref<1x512xf32, #tpu.memory_space<vmem>>, vector<1x512xf32>
    tpu.vector_store %arg4[%c0_5, %c0_6], %10 {strides = array<i32>} : memref<1x512xf32, #tpu.memory_space<vmem>>, vector<1x512xf32>,
    return
  }
  func.func @transform_0(%arg0: i32, %arg1: i32, %arg2: memref<9xf32, #tpu.memory_space<smem>>) -> (i32, i32, i32) {
    %c4_i32 = arith.constant 4 : i32
    %0 = arith.addi %c4_i32, %arg1 : i32
    %c0_i32 = arith.constant 0 : i32
    %c0_i32_0 = arith.constant 0 : i32
    return %0, %arg0, %c0_i32 : i32, i32, i32
  }
  func.func @transform_1(%arg0: i32, %arg1: i32, %arg2: memref<9xf32, #tpu.memory_space<smem>>) -> (i32, i32) {
    %c0_i32 = arith.constant 0 : i32
    %c0_i32_0 = arith.constant 0 : i32
    return %arg0, %c0_i32 : i32, i32
  }
}

</mosaic_0001>

<bundles_post_ra>
// kernel: tpu_custom_call.1
= control target key start
LH: loop header
LB: loop body
LE: loop exit
PB: predicated region body
PF: predicated region fallthrough
CT: control target
= control target key end

     0   :  { %s443_s9 = smov [#allocation3]   ;;  %s581_s0 = inlined_call_operand.hbm [shape: f32[9], index: 0, kind: input, shape index: {}]   ;;  %s582_s1 = inlined_call_operand.hbm [shape: f32[13,1,512], index: 1, kind: input, shape index: {}]   ;;  %s583_s2 = inlined_call_operand.hbm [shape: f32[1,512], index: 2, kind: output, shape index: {}]  }
   0x1   :  { %8 = dma.hbm_to_smem %s581_s0, 16, %s443_s9, [#allocation2] }
   0x2   :  { %409 = dma.done.wait [#allocation2], 16 }
   0x3   :  { %410 = vsyncadd [#allocation2], 4294967280 }
   0x4   :  { %10 = sfence }
   0x5   :  { %11 = vsyncpa [#allocation5], 0 }
   0x6   :  { %13 = vsyncpa [#allocation5 + $0x1], 0 }
   0x7   :  { %14 = vsyncpa [#allocation6], 0  ;;  %s465_s12 = smov 0   ;;  %s467_s13 = smov 0  }
   0x8   :  { %s469_s14 = smov 0   ;;  %s471_s15 = smov 0  }
   0x9   :  { %s473_s16 = smov 0   ;;  %s475_s17 = smov 0  }
   0xa LB: > { %s246_s0 = sadd.s32 4294967295, %s441_s17   ;;  %s29_s18 = sadd.s32 1, %s437_s16  ;;  %s441_s17 = sphi %s475_s17, %s20_s17   ;;  %s437_s16 = sphi %s473_s16, %s592_s16   ;;  %s433_s15 = sphi %s471_s15, %s591_s15   ;;  %s429_s14 = sphi %s469_s14, %s590_s14   ;;  %s425_s13 = sphi %s467_s13, %s589_s13   ;;  %s421_s12 = sphi %s465_s12, %s588_s12  }
   0xb   : > { %p30_p0 = scmp.ge.s32.totalorder %s29_s18, 9  ;;  %s36_s19 = sadd.s32 4, %s437_s16 }
   0xc   : > { %s43_s20 = sadd.s32 1, %s429_s14  ;;  %p50_p1 = scmp.ne.s32.totalorder %s429_s14, %s425_s13 }
   0xd   : > { %s594_s18 = smov (%p30_p0, %s29_s18), 0  ;;  %p51_p2 = scmp.eq.s32.totalorder %s441_s17, 0 }
   0xe   : > { %p56_p3 = scmp.ne.s32.totalorder %s425_s13, %s421_s12  ;;  %s37_s21 = sadd.s32 4, %s594_s18 }
   0xf   : > { %p57_p4 = scmp.eq.s32.totalorder %s246_s0, 0  ;;  %s38_s22 = ssub.s32 %s36_s19, %s37_s21 }
  0x10   : > { %p506_p5 = por %p51_p2, %p50_p1  ;;  %p41_p6 = scmp.eq.s32.totalorder %s38_s22, 0 }
  0x11   : > { %p510_p7 = por %p57_p4, %p56_p3  ;;  %p270_p8 = scmp.lt.s32.totalorder %s441_s17, 9 }
  0x12   : > { %s516_s25 = scalar_select %p41_p6, %s429_s14, %s43_s20  }
  0x13   : > { %s106_s26 = sand.u32 1, %s429_s14   ;;  %s259_s27 = sshll.u32 %s437_s16, 6 }
  0x14   : > { %s249_s28 = sshll.u32 %s106_s26, 2  ;;  %s207_s3 = scalar_lea.hbm %s582_s1, %s259_s27 }
  0x15   : > { %s208_s4 = scalar_lea.hbm %s207_s3, 256  ;;  %s110_s5 = scalar_lea.vmem [#allocation4], %s249_s28 }
  0x16   : > { %s121_s6 = sshll.u32 %s110_s5, 4  ;;  %p525_p9 = pnand %p270_p8, %p506_p5  ;;  %s122_s6 = int_to_ptr.vmem [resolvable:$true] %s121_s6 }
  0x17   : > { %p252_p10 = scmp.ge.s32.totalorder %s441_s17, 1  ;;  %p126_p11 = scmp.lt.s32.totalorder %s441_s17, 10 }
  0x18   : > { %s107_s8 = scalar_lea.sflag [#allocation5], %s106_s26  ;;  %p334_p12 = pneg %p525_p9 }
  0x19   : > { %s345_s9 = scalar_lea.vmem %s122_s6, 64  ;;  %s444_s10 = smov [#allocation4]  }
  0x1a   : > { %p346_p13 = scmp.ne.s32.totalorder %s122_s6, %s345_s9  ;;  %s350_s11 = sshll.u32 %s444_s10, 4  ;;  %s351_s11 = int_to_ptr.vmem [resolvable:$false] %s350_s11 }
  0x1b   : > { %s352_s12 = scalar_lea.vmem %s351_s11, 128  ;;  %p353_p2 = scmp.lt.s32.totalorder %s122_s6, %s351_s11 }
  0x1c   : > { %p348_p0 = pnand %p346_p13, %p334_p12  ;;  %p354_p3 = scmp.lt.s32.totalorder %s352_s12, %s345_s9 }
  0x1e   : > { %p349_p1 = pneg %p348_p0  ;;  %p355_p4 = por %p354_p3, %p353_p2 }
  0x20   : > { %p356_p5 = pnand %p355_p4, %p349_p1 }
  0x22   : > { %359 = shalt.err (!%p356_p5)
}
  0x23   : > { %269 = dma.hbm_to_vmem [thread:$0]  (!%p525_p9), %s208_s4, 64, %s122_s6, %s107_s8  }
  0x24   : > { %p127_p6 = pnand %p252_p10, %p126_p11 }
  0x25   : > { %s132_s19 = sand.u32 (!%p127_p6), 1, %s425_s13  }
  0x26   : > { %130 = sbr.rel (%p127_p6) target bundleno = 71 (0x47), region = 24  ;;  %s253_s20 = sshll.u32 (!%p127_p6), %s132_s19, 2 }
  0x27   : > { %s133_s21 = scalar_lea.sflag (!%p127_p6), [#allocation5], %s132_s19  ;;  %s136_s22 = scalar_lea.vmem (!%p127_p6), [#allocation4], %s253_s20 }
  0x2b   : > { %412 = dma.done.wait (%p510_p7), %s133_s21, 64  }
  0x2c   : > { %414 = vsyncadd (%p510_p7), %s133_s21, 4294967232  ;;  %p254_p8 = scmp.ne.s32.totalorder %s433_s15, 0 }
  0x2e   : > { %154 = sbr.rel (%p254_p8) target bundleno = 55 (0x37), region = 32 }
  0x33   : > { %v155_v0 = vlaneseq  ;;  %v445_v1 = vmov 0.0  }
  0x35   : > { %vm157_vm0 = vcmp.lt.s32.totalorder %v155_v0, 512 }
  0x36   : > { %159 = vst.msk [vmem:[#allocation7] sm:$0xf] %vm157_vm0, %v445_v1 }
  0x37 PF: > { %s161_s23 = sld [smem:[#allocation3 + %s433_s15]]  ;;  %v162_v2 = vld [vmem:[%s136_s22] sm:$0xf]  ;;  %v166_v3 = vlaneseq  ;;  %s446_s26 = smov [#allocation7]  }
  0x38   : > { %s181_s27 = sshll.u32 %s446_s26, 4  ;;  %p548_p7 = scmp.eq.s32.totalorder %s246_s0, 8  ;;  %s182_s27 = int_to_ptr.vmem [resolvable:$true] %s181_s27 }
  0x39   : > { %vm168_vm1 = vcmp.lt.s32.totalorder %v166_v3, 512  ;;  %s361_s28 = scalar_lea.vmem %s182_s27, 64  ;;  %p368_p12 = scmp.lt.s32.totalorder %s182_s27, %s182_s27 }
  0x3a   : > { %p362_p9 = scmp.ne.s32.totalorder %s182_s27, %s361_s28  ;;  %p369_p13 = scmp.lt.s32.totalorder %s361_s28, %s361_s28 }
  0x3c   : > { %p363_p10 = pnand %p362_p9, %p548_p7  ;;  %p370_p0 = por %p369_p13, %p368_p12 }
  0x3d   : > { %v160_v4 = vld [vmem:[#allocation7] sm:$0xf]  ;;  %v163_v5 = vstv %s161_s23 }
  0x3e   : > { %v164_v6 = vmul.f32 %v163_v5, %v162_v2  ;;  %p364_p11 = pneg %p363_p10 }
  0x40   : > { %v165_v7 = vadd.f32 %v164_v6, %v160_v4  ;;  %p371_p1 = pnand %p370_p0, %p364_p11 }
  0x42   : > { %170 = vst.msk [vmem:[#allocation7] sm:$0xf] %vm168_vm1, %v165_v7 }
  0x43   : > { %374 = shalt.err (!%p371_p1)
}
  0x44   : > { %263 = dma.vmem_to_hbm [thread:$0]  (%p548_p7), %s182_s27, 64, %s583_s2, [#allocation6]  }
  0x45   : > { %416 = dma.done.wait (%p548_p7), [#allocation6], 64  }
  0x46   : > { %418 = vsyncadd (%p548_p7), [#allocation6], 4294967232 }
  0x47 PF: > { %s20_s17 = sadd.s32 1, %s441_s17   ;;  %s588_s12 = smov %s425_s13 }
  0x48   : > { %p17_p2 = scmp.ge.s32.totalorder %s20_s17, 11   ;;  %s589_s13 = smov %s429_s14 }
  0x49   : > { %s590_s14 = smov %s516_s25  ;;  %s591_s15 = smov %s437_s16 }
  0x4a   : > { %s592_s16 = smov %s594_s18  ;;  %19 = sbr.rel (!%p17_p2) target bundleno = 10 (0xa), region = 66 }
  0x4f   :  { %194 = vsyncpa [#allocation5], 1 }
  0x50   :  { %196 = vsyncpa [#allocation5 + $0x1], 1 }
  0x51   :  { %197 = vsyncpa [#allocation6], 1 }
  0x52   :  { %199 = vsyncpa [#allocation6 + $0x1], 1 }

</bundles_post_ra>
